<compile_context>
chip_gen: v7x
topology: tpu7x:2x2x1
jax: 0.10.0
libtpu: 0.0.40
codegen_flags: <defaults>
</compile_context>

<pallas_src>
import functools

import numpy as np
import jax
import jax.numpy as jnp
from jax.experimental import pallas as pl
from jax.experimental.pallas import tpu as pltpu


# Column indices of the per-output-channel constant table (shape (O, 8), f32).
# Output channel o = a*no + j  (a = anchor index, j = box/obj/cls component).
_COL_BIAS = 0    # conv bias
_COL_ANCHOR = 1  # anchor w (j==2) / anchor h (j==3), else 0
_COL_XY = 2      # 1.0 where j in {0, 1}
_COL_WH = 3      # 1.0 where j in {2, 3}
_COL_J0 = 4      # 1.0 where j == 0 (gets gx)
_COL_J1 = 5      # 1.0 where j == 1 (gets gy)
_COL_REST = 6    # 1.0 where j >= 4 (obj + cls passthrough)


def _detect_kernel(x_ref, w_ref, tab_ref, raw_ref, dec_ref, *, stride, nx, ts):
    # 1x1 conv over channels == W(O, C) @ X(C, TS) on the MXU (bf16 in, f32 acc).
    xb = x_ref[...].astype(jnp.bfloat16)                       # (C, TS)
    p = jnp.dot(w_ref[...], xb, preferred_element_type=jnp.float32)  # (O, TS)

    tab = tab_ref[...]                                         # (O, 8)
    p = p + tab[:, _COL_BIAS:_COL_BIAS + 1]
    raw_ref[...] = p                                           # pre-sigmoid conv out

    s = jax.nn.sigmoid(p)

    # Per-lane grid offsets inside this image: lane index l = y*nx + x, so
    # gx = l mod nx, gy = l div nx.  Computed on a (1, TS) row (lane iota) and
    # broadcast against (O, 1) masks; all f32 (exact while ny*nx < 2**24).
    cols = (pl.program_id(1) * ts
            + jax.lax.broadcasted_iota(jnp.int32, (1, ts), 1)).astype(jnp.float32)
    gy = jnp.floor(cols / float(nx))
    gx = cols - gy * float(nx)
    grid_add = (gx * tab[:, _COL_J0:_COL_J0 + 1]
                + gy * tab[:, _COL_J1:_COL_J1 + 1])

    s2 = s * 2.0
    xy = (s2 - 0.5 + grid_add) * stride                        # j in {0, 1}
    wh = (s2 * s2) * tab[:, _COL_ANCHOR:_COL_ANCHOR + 1]       # j in {2, 3}
    dec_ref[...] = (tab[:, _COL_XY:_COL_XY + 1] * xy
                    + tab[:, _COL_WH:_COL_WH + 1] * wh
                    + tab[:, _COL_REST:_COL_REST + 1] * s)


def _choose_ts(s_pad, bs, c, x_elem_bytes):
    """Spatial lane-tile: largest multiple of 128 dividing s_pad such that the
    X tile stays <= 4 MiB (double-buffered working set is tiny on all chips)
    and the grid has >= 4 steps (>= 2 per TensorCore on v7x); falls back to
    >= 2 / >= 1 steps for tiny inputs."""
    budget = 4 << 20
    cands = [t for t in range(128, s_pad + 1, 128)
             if s_pad % t == 0 and t * c * x_elem_bytes <= budget]
    if not cands:
        return 128
    for min_steps in (4, 2, 1):
        ok = [t for t in cands if bs * (s_pad // t) >= min_steps]
        if ok:
            return max(ok)
    return 128


def detect_level(x_nchw, weight, bias, anchors_l, stride, na, no):
    """One detection level: 1x1 conv + sigmoid + box decode (fused kernel)."""
    bs, C, ny, nx = x_nchw.shape
    O = na * no
    S = ny * nx
    # gx/gy are recomputed in f32 from the lane index; exact only below 2**24.
    assert S < (1 << 24), "f32 grid-offset recompute requires ny*nx < 2**24"

    S_pad = pl.cdiv(S, 128) * 128

    # glue: NCHW -> (bs, C, ny*nx) is a free reshape (no transpose copy).
    # If the spatial tail needs lane padding, cast+pad to bf16 in one fused
    # pass; otherwise feed f32 directly and cast to bf16 inside the kernel
    # (avoids an extra full-tensor HBM round trip).
    X = x_nchw.reshape(bs, C, S)
    if S_pad != S:
        X = jnp.pad(X.astype(jnp.bfloat16), ((0, 0), (0, 0), (0, S_pad - S)))

    TS = _choose_ts(S_pad, bs, C, X.dtype.itemsize)

    # conv weight (O, C, 1, 1) -> (O, C), bf16 MXU feed (tiny).
    W = weight.reshape(O, C).astype(jnp.bfloat16)

    # Per-output-channel constants packed in one (O, 8) f32 table; o = a*no + j.
    # NOTE: anchors are applied as-is, matching this module's anchor_grid
    # (anchors.clone()); checkpoints storing stride-normalized anchors would
    # need anchors*stride here.
    o_idx = jnp.arange(O)
    j = o_idx % no
    a = o_idx // no
    f32m = lambda m: m.astype(jnp.float32)
    anchor_col = jnp.where(j == 2, anchors_l[a, 0], 0.0)
    anchor_col = jnp.where(j == 3, anchors_l[a, 1], anchor_col)
    table = jnp.stack([
        bias.reshape(O).astype(jnp.float32),
        anchor_col.astype(jnp.float32),
        f32m(j < 2),                      # xy mask
        f32m((j >= 2) & (j < 4)),         # wh mask
        f32m(j == 0),                     # gx blend mask
        f32m(j == 1),                     # gy blend mask
        f32m(j >= 4),                     # obj/cls passthrough mask
        jnp.zeros((O,), jnp.float32),
    ], axis=1)                            # (O, 8)

    kern = functools.partial(_detect_kernel, stride=float(stride),
                             nx=int(nx), ts=int(TS))
    raw, dec = pl.pallas_call(
        kern,
        out_shape=(jax.ShapeDtypeStruct((bs, O, S_pad), jnp.float32),
                   jax.ShapeDtypeStruct((bs, O, S_pad), jnp.float32)),
        grid=(bs, S_pad // TS),
        in_specs=[
            pl.BlockSpec((None, C, TS), lambda b, s: (b, 0, s)),  # activations
            pl.BlockSpec((O, C), lambda b, s: (0, 0)),            # conv weight
            pl.BlockSpec((O, 8), lambda b, s: (0, 0)),            # const table
        ],
        out_specs=(pl.BlockSpec((None, O, TS), lambda b, s: (b, 0, s)),
                   pl.BlockSpec((None, O, TS), lambda b, s: (b, 0, s))),
        compiler_params=pltpu.CompilerParams(
            dimension_semantics=("parallel", "parallel")),
    )(X, W, table)

    # glue: drop the spatial tail pad, back to torch conventions.
    raw = raw[:, :, :S]
    dec = dec[:, :, :S]
    # (bs, O, S) -> (bs, na, no, ny, nx) -> (bs, na, ny, nx, no)  == torch x[i]
    x_out = raw.reshape(bs, na, no, ny, nx).transpose(0, 1, 3, 4, 2)
    z_i = dec.reshape(bs, na, no, ny, nx).transpose(0, 1, 3, 4, 2).reshape(bs, -1, no)
    return x_out, z_i


def detect_forward(xs, weights, biases, anchors, strides, na, no):
    """Inference-mode Detect.forward: returns (cat(z, 1), [x_i permuted])."""
    x_outs, zs = [], []
    for i in range(len(xs)):
        xo, zi = detect_level(xs[i], weights[i], biases[i],
                              anchors[i], strides[i], na, no)
        x_outs.append(xo)
        zs.append(zi)
    return jnp.concatenate(zs, axis=1), x_outs


def ref_forward(xs, weights, biases, anchors, strides, na, no):
    """Pure-JAX reference mirroring the PyTorch forward.

    X and W are round-tripped through bf16 to match the kernel's MXU feed
    precision; accumulation and all decode math stay f32 (like the kernel),
    so this isolates logic/indexing errors from benign bf16 rounding.
    """
    zs, x_outs = [], []
    for i, x in enumerate(xs):
        bs, C, ny, nx = x.shape
        O = na * no
        xq = x.astype(jnp.bfloat16).astype(jnp.float32)
        wq = weights[i].reshape(O, C).astype(jnp.bfloat16).astype(jnp.float32)
        p = jnp.einsum("bchw,oc->bohw", xq, wq,
                       precision=jax.lax.Precision.HIGHEST) \
            + biases[i][None, :, None, None]
        p = p.reshape(bs, na, no, ny, nx).transpose(0, 1, 3, 4, 2)
        y = jax.nn.sigmoid(p)
        yv, xv = jnp.meshgrid(jnp.arange(ny), jnp.arange(nx), indexing="ij")
        grid = jnp.stack((xv, yv), 2).reshape(1, 1, ny, nx, 2).astype(jnp.float32)
        xy = (y[..., 0:2] * 2.0 - 0.5 + grid) * strides[i]
        wh = (y[..., 2:4] * 2.0) ** 2 * anchors[i].reshape(1, na, 1, 1, 2)
        yd = jnp.concatenate([xy, wh, y[..., 4:]], -1)
        zs.append(yd.reshape(bs, -1, no))
        x_outs.append(p)
    return jnp.concatenate(zs, 1), x_outs


if __name__ == "__main__":
    # small config consistent with the module (nc shrunk, ch shrunk)
    nc = 3
    no = nc + 5          # 8
    na = 3
    nl = 3
    ch = [8, 16, 32]
    strides = [8, 16, 32]
    anchors = jnp.array([[10, 13, 16, 30, 33, 23],
                         [30, 61, 62, 45, 59, 119],
                         [116, 90, 156, 198, 373, 326]],
                        dtype=jnp.float32).reshape(nl, na, 2)

    bs = 2
    spatial = [16, 8, 4]

    key = jax.random.PRNGKey(0)
    level_keys = jax.random.split(key, nl)
    xs, weights, biases = [], [], []
    for i in range(nl):
        kx, kw, kb = jax.random.split(level_keys[i], 3)
        xs.append(jax.random.normal(kx, (bs, ch[i], spatial[i], spatial[i]),
                                    dtype=jnp.float32))
        weights.append(0.1 * jax.random.normal(kw, (na * no, ch[i], 1, 1),
                                               dtype=jnp.float32))
        biases.append(0.1 * jax.random.normal(kb, (na * no,), dtype=jnp.float32))

    z, x_outs = detect_forward(xs, weights, biases, anchors, strides, na, no)
    z = jax.block_until_ready(z)
    x_outs = [jax.block_until_ready(t) for t in x_outs]

    # verify against the plain-JAX reference
    z_ref, x_ref = ref_forward(xs, weights, biases, anchors, strides, na, no)
    assert z.shape == (bs, sum(na * s * s for s in spatial), no)
    assert np.allclose(np.asarray(z), np.asarray(z_ref), rtol=1e-2, atol=1e-2)
    for got, want in zip(x_outs, x_ref):
        assert got.shape == want.shape
        assert np.allclose(np.asarray(got), np.asarray(want), rtol=1e-2, atol=1e-2)

    print("KERNEL_OK")
</pallas_src>

<mosaic_0001>
module attributes {stable_mosaic.version = 11 : i64} {
  func.func @_detect_kernel(%arg0: i32, %arg1: i32, %arg2: memref<1x8x128xf32, #tpu.memory_space<vmem>>, %arg3: memref<24x8xbf16, #tpu.memory_space<vmem>>, %arg4: memref<24x8xf32, #tpu.memory_space<vmem>>, %arg5: memref<1x24x128xf32, #tpu.memory_space<vmem>>, %arg6: memref<1x24x128xf32, #tpu.memory_space<vmem>>) attributes {dimension_semantics = [#tpu.dimension_semantics<parallel>, #tpu.dimension_semantics<parallel>], iteration_bounds = array<i64: 2, 2>, scalar_prefetch = 0 : i64, scratch_operands = 0 : i64, tpu.core_type = #tpu.core_type<tc>, window_params = [{transform_indices = @transform_0, window_bounds = array<i64: 1, 8, 128>}, {pipeline_mode = #tpu.pipeline_mode<synchronous>, transform_indices = @transform_1, window_bounds = array<i64: 24, 8>}, {pipeline_mode = #tpu.pipeline_mode<synchronous>, transform_indices = @transform_2, window_bounds = array<i64: 24, 8>}, {transform_indices = @transform_3, window_bounds = array<i64: 1, 24, 128>}, {transform_indices = @transform_4, window_bounds = array<i64: 1, 24, 128>}]} {
    %c0 = arith.constant 0 : index
    %c0_0 = arith.constant 0 : index
    %c0_1 = arith.constant 0 : index
    %0 = vector.load %arg2[%c0, %c0_0, %c0_1] : memref<1x8x128xf32, #tpu.memory_space<vmem>>, vector<1x8x128xf32>
    %1 = vector.shape_cast %0 : vector<1x8x128xf32> to vector<8x128xf32>
    %2 = arith.truncf %1 : vector<8x128xf32> to vector<8x128xbf16>
    %c0_2 = arith.constant 0 : index
    %c0_3 = arith.constant 0 : index
    %3 = vector.load %arg3[%c0_2, %c0_3] : memref<24x8xbf16, #tpu.memory_space<vmem>>, vector<24x8xbf16>
    %cst = arith.constant dense<0.000000e+00> : vector<24x128xf32>
    %4 = tpu.matmul %3, %2, %cst {dimension_numbers = #tpu.dot_dimension_numbers<[1], [0], [0], [1], [0, 0, 1, 1], [], []>} : vector<24x8xbf16>, vector<8x128xbf16>, vector<24x128xf32> -> vector<24x128xf32>
    %c0_4 = arith.constant 0 : index
    %c0_5 = arith.constant 0 : index
    %5 = vector.load %arg4[%c0_4, %c0_5] : memref<24x8xf32, #tpu.memory_space<vmem>>, vector<24x8xf32>
    %6 = vector.extract_strided_slice %5 {offsets = [0, 0], sizes = [24, 1], strides = [1, 1]} : vector<24x8xf32> to vector<24x1xf32>
    %7 = vector.broadcast %6 : vector<24x1xf32> to vector<24x128xf32>
    %8 = arith.addf %4, %7 : vector<24x128xf32>
    %c0_6 = arith.constant 0 : index
    %c0_7 = arith.constant 0 : index
    %c0_8 = arith.constant 0 : index
    %9 = vector.load %arg5[%c0_6, %c0_7, %c0_8] : memref<1x24x128xf32, #tpu.memory_space<vmem>>, vector<1x24x128xf32>
    %10 = vector.shape_cast %9 : vector<1x24x128xf32> to vector<24x128xf32>
    %11 = vector.shape_cast %8 : vector<24x128xf32> to vector<1x24x128xf32>
    tpu.vector_store %arg5[%c0_6, %c0_7, %c0_8], %11 {strides = array<i32>} : memref<1x24x128xf32, #tpu.memory_space<vmem>>, vector<1x24x128xf32>,
    %12 = arith.negf %8 : vector<24x128xf32>
    %13 = math.exp %12 : vector<24x128xf32>
    %cst_9 = arith.constant 1.000000e+00 : f32
    %14 = vector.broadcast %cst_9 : f32 to vector<24x128xf32>
    %15 = arith.addf %14, %13 : vector<24x128xf32>
    %16 = arith.divf %14, %15 : vector<24x128xf32>
    %c128_i32 = arith.constant 128 : i32
    %17 = arith.muli %arg1, %c128_i32 : i32
    %18 = tpu.iota {dimensions = array<i32: 1>} : vector<1x128xi32>
    %19 = vector.broadcast %17 : i32 to vector<1x128xi32>
    %20 = arith.addi %19, %18 : vector<1x128xi32>
    %21 = arith.sitofp %20 : vector<1x128xi32> to vector<1x128xf32>
    %cst_10 = arith.constant 1.600000e+01 : f32
    %22 = vector.broadcast %cst_10 : f32 to vector<1x128xf32>
    %23 = arith.divf %21, %22 : vector<1x128xf32>
    %24 = math.floor %23 : vector<1x128xf32>
    %cst_11 = arith.constant 1.600000e+01 : f32
    %25 = vector.broadcast %cst_11 : f32 to vector<1x128xf32>
    %26 = arith.mulf %24, %25 : vector<1x128xf32>
    %27 = arith.subf %21, %26 : vector<1x128xf32>
    %28 = vector.extract_strided_slice %5 {offsets = [0, 4], sizes = [24, 1], strides = [1, 1]} : vector<24x8xf32> to vector<24x1xf32>
    %29 = vector.broadcast %27 : vector<1x128xf32> to vector<24x128xf32>
    %30 = vector.broadcast %28 : vector<24x1xf32> to vector<24x128xf32>
    %31 = arith.mulf %29, %30 : vector<24x128xf32>
    %32 = vector.extract_strided_slice %5 {offsets = [0, 5], sizes = [24, 1], strides = [1, 1]} : vector<24x8xf32> to vector<24x1xf32>
    %33 = vector.broadcast %24 : vector<1x128xf32> to vector<24x128xf32>
    %34 = vector.broadcast %32 : vector<24x1xf32> to vector<24x128xf32>
    %35 = arith.mulf %33, %34 : vector<24x128xf32>
    %36 = arith.addf %31, %35 : vector<24x128xf32>
    %cst_12 = arith.constant 2.000000e+00 : f32
    %37 = vector.broadcast %cst_12 : f32 to vector<24x128xf32>
    %38 = arith.mulf %16, %37 : vector<24x128xf32>
    %cst_13 = arith.constant 5.000000e-01 : f32
    %39 = vector.broadcast %cst_13 : f32 to vector<24x128xf32>
    %40 = arith.subf %38, %39 : vector<24x128xf32>
    %41 = arith.addf %40, %36 : vector<24x128xf32>
    %cst_14 = arith.constant 8.000000e+00 : f32
    %42 = vector.broadcast %cst_14 : f32 to vector<24x128xf32>
    %43 = arith.mulf %41, %42 : vector<24x128xf32>
    %44 = arith.mulf %38, %38 : vector<24x128xf32>
    %45 = vector.extract_strided_slice %5 {offsets = [0, 1], sizes = [24, 1], strides = [1, 1]} : vector<24x8xf32> to vector<24x1xf32>
    %46 = vector.broadcast %45 : vector<24x1xf32> to vector<24x128xf32>
    %47 = arith.mulf %44, %46 : vector<24x128xf32>
    %48 = vector.extract_strided_slice %5 {offsets = [0, 2], sizes = [24, 1], strides = [1, 1]} : vector<24x8xf32> to vector<24x1xf32>
    %49 = vector.broadcast %48 : vector<24x1xf32> to vector<24x128xf32>
    %50 = arith.mulf %49, %43 : vector<24x128xf32>
    %51 = vector.extract_strided_slice %5 {offsets = [0, 3], sizes = [24, 1], strides = [1, 1]} : vector<24x8xf32> to vector<24x1xf32>
    %52 = vector.broadcast %51 : vector<24x1xf32> to vector<24x128xf32>
    %53 = arith.mulf %52, %47 : vector<24x128xf32>
    %54 = arith.addf %50, %53 : vector<24x128xf32>
    %55 = vector.extract_strided_slice %5 {offsets = [0, 6], sizes = [24, 1], strides = [1, 1]} : vector<24x8xf32> to vector<24x1xf32>
    %56 = vector.broadcast %55 : vector<24x1xf32> to vector<24x128xf32>
    %57 = arith.mulf %56, %16 : vector<24x128xf32>
    %58 = arith.addf %54, %57 : vector<24x128xf32>
    %c0_15 = arith.constant 0 : index
    %c0_16 = arith.constant 0 : index
    %c0_17 = arith.constant 0 : index
    %59 = vector.load %arg6[%c0_15, %c0_16, %c0_17] : memref<1x24x128xf32, #tpu.memory_space<vmem>>, vector<1x24x128xf32>
    %60 = vector.shape_cast %59 : vector<1x24x128xf32> to vector<24x128xf32>
    %61 = vector.shape_cast %58 : vector<24x128xf32> to vector<1x24x128xf32>
    tpu.vector_store %arg6[%c0_15, %c0_16, %c0_17], %61 {strides = array<i32>} : memref<1x24x128xf32, #tpu.memory_space<vmem>>, vector<1x24x128xf32>,
    return
  }
  func.func @transform_0(%arg0: i32, %arg1: i32) -> (i32, i32, i32) {
    %c0_i32 = arith.constant 0 : i32
    %c0_i32_0 = arith.constant 0 : i32
    return %arg0, %c0_i32, %arg1 : i32, i32, i32
  }
  func.func @transform_1(%arg0: i32, %arg1: i32) -> (i32, i32) {
    %c0_i32 = arith.constant 0 : i32
    %c0_i32_0 = arith.constant 0 : i32
    %c0_i32_1 = arith.constant 0 : i32
    return %c0_i32, %c0_i32_0 : i32, i32
  }
  func.func @transform_2(%arg0: i32, %arg1: i32) -> (i32, i32) {
    %c0_i32 = arith.constant 0 : i32
    %c0_i32_0 = arith.constant 0 : i32
    %c0_i32_1 = arith.constant 0 : i32
    return %c0_i32, %c0_i32_0 : i32, i32
  }
  func.func @transform_3(%arg0: i32, %arg1: i32) -> (i32, i32, i32) {
    %c0_i32 = arith.constant 0 : i32
    %c0_i32_0 = arith.constant 0 : i32
    return %arg0, %c0_i32, %arg1 : i32, i32, i32
  }
  func.func @transform_4(%arg0: i32, %arg1: i32) -> (i32, i32, i32) {
    %c0_i32 = arith.constant 0 : i32
    %c0_i32_0 = arith.constant 0 : i32
    return %arg0, %c0_i32, %arg1 : i32, i32, i32
  }
}

</mosaic_0001>

<bundles_post_ra>
// kernel: tpu_custom_call.1
= control target key start
LH: loop header
LB: loop body
LE: loop exit
PB: predicated region body
PF: predicated region fallthrough
CT: control target
= control target key end

     0   :  { %10 = vsyncpa [#allocation3], 0  ;;  %s1173_s0 = inlined_call_operand.vmem [shape: f32[2,8,256], index: 0, kind: input, shape index: {}]   ;;  %s1174_s1 = inlined_call_operand.vmem [shape: bf16[24,8], index: 1, kind: input, shape index: {}]   ;;  %s1175_s2 = inlined_call_operand.vmem [shape: f32[24,8], index: 2, kind: input, shape index: {}]   ;;  %s1176_s3 = inlined_call_operand.hbm [shape: f32[2,24,256], index: 3, kind: output, shape index: {0}]   ;;  %s1177_s4 = inlined_call_operand.hbm [shape: f32[2,24,256], index: 4, kind: output, shape index: {1}]  }
   0x1   :  { %12 = vsyncpa [#allocation3 + $0x1], 0 }
   0x2   :  { %13 = vsyncpa [#allocation5], 0 }
   0x3   :  { %15 = vsyncpa [#allocation5 + $0x1], 0  ;;  %s940_s15 = smov 0   ;;  %s942_s16 = smov 0  }
   0x4   :  { %s944_s17 = smov 0   ;;  %s946_s18 = smov 0  }
   0x5   :  { %s948_s19 = smov 0   ;;  %s950_s20 = smov 0  }
   0x6   :  { %s952_s21 = smov 0   ;;  %s954_s22 = smov 0  }
   0x7 LB: > { %s626_s23 = sadd.s32 4294967295, %s901_s22   ;;  %s627_s24 = sadd.s32 4294967294, %s901_s22   ;;  %s901_s22 = sphi %s954_s22, %s21_s22   ;;  %s897_s21 = sphi %s952_s21, %s1190_s21   ;;  %s893_s20 = sphi %s950_s20, %s1189_s20   ;;  %s889_s19 = sphi %s948_s19, %s1188_s19   ;;  %s885_s18 = sphi %s946_s18, %s1187_s18   ;;  %s881_s17 = sphi %s944_s17, %s1186_s17   ;;  %s877_s16 = sphi %s942_s16, %s1185_s16   ;;  %s873_s15 = sphi %s940_s15, %s1184_s15  }
   0x8   : > { %s30_s25 = sadd.s32 1, %s893_s20  ;;  %s33_s26 = sadd.s32 1, %s897_s21 }
   0x9   : > { %p31_p0 = scmp.ge.s32.totalorder %s30_s25, 2  ;;  %p122_p1 = scmp.ne.s32.totalorder %s881_s17, %s877_s16 }
   0xa   : > { %p123_p2 = scmp.eq.s32.totalorder %s626_s23, 3  ;;  %p128_p5 = scmp.ne.s32.totalorder %s877_s16, %s873_s15 }
   0xb   : > { %s1192_s25 = smov (%p31_p0, %s30_s25), 0  ;;  %s1194_s26 = smov (!%p31_p0, %s33_s26), %s897_s21 }
   0xc   : > { %s108_s27 = ssub.s32 %s893_s20, %s1192_s25  ;;  %p991_p3 = por %p123_p2, %p122_p1 }
   0xd   : > { %p35_p4 = scmp.ge.s32.totalorder %s1194_s26, 2  ;;  %p129_p6 = scmp.eq.s32.totalorder %s627_s24, 3 }
   0xe   : > { %p630_p7 = scmp.ge.s32.totalorder %s901_s22, 1  ;;  %p192_p9 = scmp.lt.s32.totalorder %s901_s22, 5 }
   0xf   : > { %s1196_s26 = smov (%p35_p4, %s1194_s26), 0  ;;  %p1000_p8 = por %p129_p6, %p128_p5 }
  0x10   : > { %s107_s30 = ssub.s32 %s897_s21, %s1196_s26  ;;  %s112_s5 = sadd.s32 1, %s881_s17 }
  0x11   : > { %s109_s6 = sor.u32 %s108_s27, %s107_s30  ;;  %p193_p10 = pnand %p630_p7, %p192_p9 }
  0x12   : > { %p110_p11 = scmp.eq.s32.totalorder %s109_s6, 0  ;;  %p226_p12 = scmp.lt.s32.totalorder (!%p193_p10), %s889_s19, 1  ;;  %v761_v0 = vld [vmem:[%s1174_s1] sm:$0xff] (!%p193_p10)   ;;  %vm266_vm0 = vcmask (!%p193_p10), 64512   ;;  %v903_v1 = vmov (!%p193_p10), 0   ;;  %v242_v2 = vld [vmem:[%s1175_s2 + $0x10] sm:$0xff] (!%p193_p10)  ;;  %v347_v21 = vlaneseq (!%p193_p10) }
  0x13   : > { %196 = sbr.rel (%p193_p10) target bundleno = 322 (0x142), region = 32  ;;  %p228_p13 = scmp.lt.s32.totalorder (!%p193_p10), %s885_s18, 1  ;;  %653 = vmatprep.mubr.msk.bf16.mxu0 (!%p193_p10), %vm266_vm0, %v761_v0  ;;  %748 = vset.pattern.permute.xlu1 (!%p193_p10), %v903_v1  ;;  %v240_v3 = vld [vmem:[%s1175_s2] sm:$0xff] (!%p193_p10)  ;;  %v241_v4 = vld [vmem:[%s1175_s2 + $0x8] sm:$0xff] (!%p193_p10)  ;;  %v904_v5 = vmov (!%p193_p10), 4   ;;  %vm273_vm1 = vcmask (!%p193_p10), 1043456  }
  0x14   : > { %s1009_s7 = scalar_select %p110_p11, %s881_s17, %s112_s5  }
  0x15   : > { %255 = vperm.xlu1 (!%p193_p10), %748, %v242_v2   ;;  %747 = vset.pattern.permute.xlu0 (!%p193_p10), %v903_v1  ;;  %v762_v9 = vld [vmem:[%s1174_s1 + $0x8] ss:$0 sps:$4 sm:$0xff] (!%p193_p10)   ;;  %v905_v10 = vmov (!%p193_p10), 5   ;;  %v906_v11 = vmov (!%p193_p10), 1   ;;  %v907_v12 = vmov (!%p193_p10), 2   ;;  %v908_v13 = vmov (!%p193_p10), 3  }
  0x16   : > { %245 = vperm.xlu0 (!%p193_p10), %747, %v240_v3   ;;  %v909_v14 = vmov (!%p193_p10), 6   ;;  %s659_s14 = smul.u32 (!%p193_p10), 6, %s889_s19  ;;  %v348_v23 = vand.u32 (!%p193_p10), 127, %v347_v21 }
  0x19   : > { %749 = vset.pattern.permute.xlu1 (!%p193_p10), %v904_v5 }
  0x1a   : > { %s227_s10 = scalar_select %p226_p12, %s889_s19, 1  ;;  %358 = vperm.xlu1 %749, %v240_v3   ;;  %250 = vperm.xlu0 %747, %v241_v4  }
  0x1b   : > { %s229_s13 = scalar_select %p228_p13, %s885_s18, 1 }
  0x1c   : > { %s631_s24 = sshll.u32 %s227_s10, 1  ;;  %s910_s10 = smov [#allocation2]  }
  0x1d   : > { %s231_s27 = sadd.s32 %s631_s24, %s229_s13  ;;  %s1044_s13 = sand.u32 1, %s877_s16  }
  0x1e   : > { %s632_s6 = sshll.u32 %s231_s27, 3  ;;  %366 = vperm.xlu1 %749, %v242_v2   ;;  %750 = vset.pattern.permute.xlu0 %v904_v5  ;;  %s658_s23 = smul.u32 24, %s1044_s13 }
  0x1f   : > { %s233_s11 = scalar_lea.vmem %s1173_s0, %s632_s6  ;;  %362 = vperm.xlu0 %750, %v241_v4   ;;  %s640_s24 = sshll.u32 %s885_s18, 7 }
  0x20   : > { %v235_v6 = vld [vmem:[%s233_s11] sm:$0xff]  ;;  %s1052_s27 = sadd.s32 %s885_s18, %s659_s14  ;;  %s218_s30 = scalar_lea.vmem [#allocation2], %s658_s23  ;;  %v349_v24 = vstv %s640_s24 }
  0x21   : > { %v236_v7 = vpack.c.bf16 %v235_v6, %v235_v6  ;;  %s494_s5 = sshll.u32 %s218_s30, 4  ;;  %s1178_s6 = sshll.u32 %s1052_s27, 7  ;;  %v1061_v31 = vadd.s32 %v349_v24, %v348_v23  ;;  %s1059_s5 = int_to_ptr.vmem [resolvable:$true] %s494_s5 }
  0x22   : > { %751 = vset.pattern.permute.xlu1 %v905_v10  ;;  %s1068_s8 = scalar_lea.hbm %s1176_s3, %s1178_s6  ;;  %s475_s9 = scalar_lea.sflag [#allocation3], %s1044_s13 }
  0x23   : > { %657 = vmatprep.subr.msk.bf16.mxu0 %vm273_vm1, %v236_v7  ;;  %v275_v8 = vsel %vm273_vm1, %v236_v7, 0  ;;  %373 = vperm.xlu1 %751, %v240_v3   ;;  %v351_v39 = vcvt.s32.f32 %v1061_v31  ;;  %s775_s11 = scalar_lea.vmem %s1059_s5, 384  ;;  %s779_s12 = sshll.u32 %s910_s10, 4  ;;  %s780_s12 = int_to_ptr.vmem [resolvable:$false] %s779_s12 }
  0x24   : > { %652 = vmatpush3.bf16.msra.mxu0 %v275_v8  ;;  %752 = vset.pattern.permute.xlu0 %v905_v10  ;;  %p776_p0 = scmp.ne.s32.totalorder %s1059_s5, %s775_s11  ;;  %s781_s14 = scalar_lea.vmem %s780_s12, 768 }
  0x25   : > { %377 = vperm.xlu0 %752, %v241_v4   ;;  %p782_p4 = scmp.lt.s32.totalorder %s1059_s5, %s780_s12  ;;  %p783_p5 = scmp.lt.s32.totalorder %s781_s14, %s775_s11 }
  0x26   : > { %p777_p1 = pnand %p776_p0, %p991_p3 }
  0x27   : > { %654 = vmatmul.mubr.msk.bf16.vlgmr.msra.gmra.mrb[0].mxu0 %vm266_vm0, %v762_v9  ;;  %381 = vperm.xlu1 %751, %v242_v2   ;;  %p784_p6 = por %p783_p5, %p782_p4 }
  0x28   : > { %p778_p2 = pneg %p777_p1 }
  0x29   : > { %754 = vset.pattern.permute.xlu0 %v906_v11 }
  0x2a   : > { %410 = vperm.xlu0 %754, %v241_v4   ;;  %p785_p7 = pnand %p784_p6, %p778_p2 }
  0x2b   : > { %753 = vset.pattern.permute.xlu1 %v906_v11 }
  0x2c   : > { %406 = vperm.xlu1 %753, %v240_v3  }
  0x2e   : > { %756 = vset.pattern.permute.xlu0 %v907_v12 }
  0x2f   : > { %425 = vperm.xlu0 %756, %v241_v4  }
  0x30   : > { %414 = vperm.xlu1 %753, %v242_v2  }
  0x33   : > { %758 = vset.pattern.permute.xlu0 %v908_v13 }
  0x34   : > { %755 = vset.pattern.permute.xlu1 %v907_v12  ;;  %440 = vperm.xlu0 %758, %v241_v4  }
  0x35   : > { %421 = vperm.xlu1 %755, %v240_v3  }
  0x38   : > { %760 = vset.pattern.permute.xlu0 %v909_v14 }
  0x39   : > { %429 = vperm.xlu1 %755, %v242_v2   ;;  %458 = vperm.xlu0 %760, %v241_v4  }
  0x3d   : > { %757 = vset.pattern.permute.xlu1 %v908_v13 }
  0x3e   : > { %436 = vperm.xlu1 %757, %v240_v3  }
  0x42   : > { %444 = vperm.xlu1 %757, %v242_v2  }
  0x46   : > { %759 = vset.pattern.permute.xlu1 %v909_v14 }
  0x47   : > { %454 = vperm.xlu1 %759, %v240_v3  }
  0x4b   : > { %462 = vperm.xlu1 %759, %v242_v2  }
  0x94   : > { %v256_v15 = vpop.permute.xlu1 %255 }
  0x95   : > { %v246_v22 = vpop.permute.xlu0 %245 }
  0x99   : > { %v1035_v16 = vpop.permute.xlu1 %358  ;;  %v251_v32 = vpop.permute.xlu0 %250 }
  0x9d   : > { %v1037_v17 = vpop.permute.xlu1 %366 }
  0xa2   : > { %v1039_v18 = vpop.permute.xlu1 %373 }
  0xa6   : > { %v1041_v19 = vpop.permute.xlu1 %381 }
  0xab   : > { %v1047_v20 = vpop.permute.xlu1 %406 }
  0xaf   : > { %v1056_v26 = vpop.permute.xlu1 %414 }
  0xb4   : > { %v1070_v38 = vpop.permute.xlu1 %421 }
  0xfa   : > { %v655_v25 = vpop.f32.mrb[0].mxu0 }
  0xfb   : > { %v320_v27 = vadd.f32 %v655_v25, %v256_v15  ;;  %v311_v28 = vpop.f32.mrb[1].mxu0 }
  0xfc   : > { %v312_v29 = vadd.f32 %v311_v28, %v246_v22  ;;  %v656_v30 = vpop.f32.mrb[2].mxu0 }
  0xfd   : > { %327 = vst [vmem:[%s218_s30 + $0x10] sm:$0xff] %v320_v27  ;;  %v639_v33 = vmul.f32 -1.442695, %v320_v27  ;;  %v314_v34 = vpop.f32.mrb[3].mxu0 }
  0xfe   : > { %325 = vst [vmem:[%s218_s30] sm:$0xff] %v312_v29  ;;  %v637_v35 = vmul.f32 -1.442695, %v312_v29  ;;  %v315_v36 = vadd.f32 %v314_v34, %v251_v32 }
  0xff   : > { %763 = vpow2.f32 %v639_v33 }
 0x100   : > { %765 = vpow2.f32 %v637_v35  ;;  %326 = vst [vmem:[%s218_s30 + $0x8] sm:$0xff] %v315_v36  ;;  %v638_v37 = vmul.f32 -1.442695, %v315_v36 }
 0x101   : > { %788 = shalt.err (!%p785_p7)
}
 0x102   : > { %s789_s24 = scalar_lea.hbm %s1068_s8, 384  ;;  %s793_s19 = scalar_lea.hbm %s1176_s3, 1536 }
 0x103   : > { %p790_p9 = scmp.ne.s32.totalorder %s1068_s8, %s789_s24  ;;  %p794_p12 = scmp.lt.u32.totalorder %s1068_s8, %s1176_s3 }
 0x104   : > { %p795_p13 = scmp.lt.u32.totalorder %s793_s19, %s789_s24  ;;  %p797_p1 = scmp.lt.u32.totalorder %s789_s24, %s1068_s8 }
 0x105   : > { %p791_p10 = pnand %p790_p9, %p991_p3 }
 0x106   : > { %p796_p0 = por %p795_p13, %p794_p12 }
 0x107   : > { %p792_p11 = pneg %p791_p10 }
 0x108   : > { %p798_p2 = por %p797_p1, %p796_p0 }
 0x10a   : > { %p799_p4 = pnand %p798_p2, %p792_p11 }
 0x10c   : > { %802 = shalt.err (!%p799_p4)
}
 0x10d   : > { %s1179_s11 = smov 128   ;;  %s912_s14 = smov 256   ;;  %767 = vpow2.f32 %v638_v37  ;;  %v363_v40 = vpop.permute.xlu0 %362  ;;  %v353_v41 = vmul.f32 0.0625, %v351_v39  ;;  %v430_v42 = vpop.permute.xlu1 %429 }
 0x10e   : > { %s913_s6 = smov 8   ;;  %v764_v43 = vpop.eup %763  ;;  %s914_s10 = smov [#allocation4]  }
 0x10f   : > { %661 = dma.vmem_to_hbm [thread:$0]  (%p991_p3), %s1059_s5, 384, %s1068_s8, %s475_s9, %s1179_s11, %s912_s14, %s913_s6   ;;  %v354_v44 = vfloor.f32 %v353_v41  ;;  %v766_v46 = vpop.eup %765  ;;  %v339_v47 = vadd.f32 1.0, %v764_v43 }
 0x110   : > { %v337_v48 = vadd.f32 1.0, %v766_v46  ;;  %s225_s5 = scalar_lea.vmem [#allocation4], %s658_s23  ;;  %s1182_s9 = sshll.u32 %s1052_s27, 7 }
 0x111   : > { %v378_v45 = vpop.permute.xlu0 %377  ;;  %769 = vrcp.f32 %v339_v47  ;;  %v437_v50 = vpop.permute.xlu1 %436  ;;  %v355_v51 = vmul.f32 16.0, %v354_v44  ;;  %v386_v57 = vmul.f32 %v1041_v19, %v354_v44  ;;  %v384_v61 = vmul.f32 %v1039_v18, %v354_v44  ;;  %s511_s8 = sshll.u32 %s225_s5, 4  ;;  %s1116_s18 = scalar_lea.hbm %s1177_s4, %s1182_s9  ;;  %s1109_s8 = int_to_ptr.vmem [resolvable:$true] %s511_s8 }
 0x112   : > { %771 = vrcp.f32 %v337_v48  ;;  %v385_v1 = vmul.f32 %v378_v45, %v354_v44  ;;  %s480_s23 = scalar_lea.sflag [#allocation5], %s1044_s13  ;;  %s803_s19 = scalar_lea.vmem %s1109_s8, 384 }
 0x113   : > { %v356_v54 = vsub.f32 %v351_v39, %v355_v51  ;;  %p804_p5 = scmp.ne.s32.totalorder %s1109_s8, %s803_s19  ;;  %s807_s12 = sshll.u32 %s914_s10, 4  ;;  %s808_s12 = int_to_ptr.vmem [resolvable:$false] %s807_s12 }
 0x114   : > { %s809_s11 = scalar_lea.vmem %s808_s12, 768  ;;  %p810_p9 = scmp.lt.s32.totalorder %s1109_s8, %s808_s12 }
 0x115   : > { %v411_v53 = vpop.permute.xlu0 %410  ;;  %v445_v55 = vpop.permute.xlu1 %444  ;;  %v371_v56 = vmul.f32 %v1037_v17, %v356_v54  ;;  %v369_v60 = vmul.f32 %v1035_v16, %v356_v54  ;;  %v370_v0 = vmul.f32 %v363_v40, %v356_v54  ;;  %p805_p6 = pnand %p804_p5, %p991_p3  ;;  %p811_p10 = scmp.lt.s32.totalorder %s809_s11, %s803_s19 }
 0x117   : > { %v768_v49 = vpop.eup %767  ;;  %v389_v5 = vadd.f32 %v386_v57, %v371_v56  ;;  %v387_v8 = vadd.f32 %v384_v61, %v369_v60  ;;  %v388_v14 = vadd.f32 %v385_v1, %v370_v0  ;;  %p806_p7 = pneg %p805_p6  ;;  %p812_p11 = por %p811_p10, %p810_p9 }
 0x118   : > { %v338_v52 = vadd.f32 1.0, %v768_v49 }
 0x119   : > { %v426_v58 = vpop.permute.xlu0 %425  ;;  %v455_v3 = vpop.permute.xlu1 %454  ;;  %p813_p12 = pnand %p812_p11, %p806_p7 }
 0x11a   : > { %773 = vrcp.f32 %v338_v52 }
 0x11b   : > { %v770_v59 = vpop.eup %769 }
 0x11c   : > { %v772_v62 = vpop.eup %771  ;;  %v392_v63 = vmul.f32 2.0, %v770_v59 }
 0x11d   : > { %v390_v2 = vmul.f32 2.0, %v772_v62  ;;  %v441_v15 = vpop.permute.xlu0 %440  ;;  %v463_v25 = vpop.permute.xlu1 %462  ;;  %v465_v35 = vmul.f32 %v772_v62, %v455_v3 }
 0x11e   : > { %v404_v6 = vmul.f32 %v392_v63, %v392_v63  ;;  %v643_v7 = vadd.f32 -0.5, %v392_v63  ;;  %v467_v32 = vmul.f32 %v770_v59, %v463_v25 }
 0x11f   : > { %v641_v9 = vadd.f32 -0.5, %v390_v2  ;;  %v402_v10 = vmul.f32 %v390_v2, %v390_v2 }
 0x120   : > { %v419_v12 = vmul.f32 %v1056_v26, %v404_v6  ;;  %v398_v13 = vadd.f32 %v643_v7, %v389_v5 }
 0x121   : > { %v396_v16 = vadd.f32 %v641_v9, %v387_v8  ;;  %v417_v17 = vmul.f32 %v1047_v20, %v402_v10  ;;  %v459_v33 = vpop.permute.xlu0 %458 }
 0x122   : > { %v401_v21 = vmul.f32 8.0, %v398_v13  ;;  %v449_v28 = vmul.f32 %v445_v55, %v419_v12 }
 0x123   : > { %v399_v22 = vmul.f32 8.0, %v396_v16  ;;  %v447_v30 = vmul.f32 %v437_v50, %v417_v17 }
 0x124   : > { %v774_v4 = vpop.eup %773  ;;  %v434_v27 = vmul.f32 %v430_v42, %v401_v21 }
 0x125   : > { %v391_v11 = vmul.f32 2.0, %v774_v4  ;;  %v432_v29 = vmul.f32 %v1070_v38, %v399_v22  ;;  %v466_v41 = vmul.f32 %v774_v4, %v459_v33 }
 0x126   : > { %v452_v31 = vadd.f32 %v449_v28, %v434_v27 }
 0x127   : > { %v403_v18 = vmul.f32 %v391_v11, %v391_v11  ;;  %v642_v19 = vadd.f32 -0.5, %v391_v11  ;;  %v450_v34 = vadd.f32 %v447_v30, %v432_v29 }
 0x128   : > { %v470_v37 = vadd.f32 %v467_v32, %v452_v31 }
 0x129   : > { %v418_v23 = vmul.f32 %v411_v53, %v403_v18  ;;  %v397_v24 = vadd.f32 %v642_v19, %v388_v14  ;;  %v468_v39 = vadd.f32 %v465_v35, %v450_v34 }
 0x12a   : > { %473 = vst [vmem:[%s225_s5 + $0x10] sm:$0xff] %v470_v37 }
 0x12b   : > { %v400_v26 = vmul.f32 8.0, %v397_v24  ;;  %v448_v36 = vmul.f32 %v441_v15, %v418_v23  ;;  %471 = vst [vmem:[%s225_s5] sm:$0xff] %v468_v39 }
 0x12d   : > { %v433_v20 = vmul.f32 %v426_v58, %v400_v26 }
 0x12f   : > { %v451_v40 = vadd.f32 %v448_v36, %v433_v20 }
 0x131   : > { %v469_v38 = vadd.f32 %v466_v41, %v451_v40 }
 0x133   : > { %472 = vst [vmem:[%s225_s5 + $0x8] sm:$0xff] %v469_v38 }
 0x134   : > { %816 = shalt.err (!%p813_p12)
}
 0x135   : > { %s817_s27 = scalar_lea.hbm %s1116_s18, 384  ;;  %s821_s24 = scalar_lea.hbm %s1177_s4, 1536 }
 0x136   : > { %p818_p13 = scmp.ne.s32.totalorder %s1116_s18, %s817_s27  ;;  %p822_p2 = scmp.lt.u32.totalorder %s1116_s18, %s1177_s4 }
 0x137   : > { %p823_p4 = scmp.lt.u32.totalorder %s821_s24, %s817_s27  ;;  %p825_p6 = scmp.lt.u32.totalorder %s817_s27, %s1116_s18 }
 0x138   : > { %p819_p0 = pnand %p818_p13, %p991_p3 }
 0x139   : > { %p824_p5 = por %p823_p4, %p822_p2 }
 0x13a   : > { %p820_p1 = pneg %p819_p0 }
 0x13b   : > { %p826_p7 = por %p825_p6, %p824_p5 }
 0x13d   : > { %p827_p9 = pnand %p826_p7, %p820_p1 }
 0x13f   : > { %830 = shalt.err (!%p827_p9)
}
 0x140   : > { %s1183_s11 = smov 128  }
 0x141   : > { %662 = dma.vmem_to_hbm [thread:$0]  (%p991_p3), %s1109_s8, 384, %s1116_s18, %s480_s23, %s1183_s11, %s912_s14, %s913_s6  }
 0x142 PF: > { %p672_p10 = scmp.ge.s32.totalorder %s901_s22, 2  ;;  %s526_s19 = sand.u32 1, %s873_s15  }
 0x143   : > { %s527_s12 = scalar_lea.sflag [#allocation3], %s526_s19 }
 0x144   : > { %p666_p11 = pnand %p672_p10, %p1000_p8 }
 0x146   : > { %864 = dma.done.wait (!%p666_p11), %s527_s12, 384  }
 0x147   : > { %866 = vsyncadd (!%p666_p11), %s527_s12, 4294966912  ;;  %s536_s28 = scalar_lea.sflag [#allocation5], %s526_s19 }
 0x148   : > { %868 = dma.done.wait (!%p666_p11), %s536_s28, 384  }
 0x149   : > { %870 = vsyncadd (!%p666_p11), %s536_s28, 4294966912  ;;  %s21_s22 = sadd.s32 1, %s901_s22   ;;  %s1184_s15 = smov %s877_s16 }
 0x14a   : > { %p18_p12 = scmp.ge.s32.totalorder %s21_s22, 6   ;;  %s1185_s16 = smov %s881_s17 }
 0x14b   : > { %s1186_s17 = smov %s1009_s7  ;;  %s1187_s18 = smov %s893_s20 }
 0x14c   : > { %s1188_s19 = smov %s897_s21  ;;  %s1189_s20 = smov %s1192_s25 }
 0x14d   : > { %s1190_s21 = smov %s1196_s26  ;;  %20 = sbr.rel (!%p18_p12) target bundleno = 7 (0x7), region = 84 }
 0x154   :  { %541 = vsyncpa [#allocation3], 1 }
 0x155   :  { %543 = vsyncpa [#allocation3 + $0x1], 1 }
 0x156   :  { %544 = vsyncpa [#allocation5], 1 }
 0x157   :  { %546 = vsyncpa [#allocation5 + $0x1], 1 }

</bundles_post_ra>
